<compile_context>
chip_gen: v7x
topology: tpu7x:2x2x1
jax: 0.10.0
libtpu: 0.0.40
codegen_flags: <defaults>
</compile_context>

<pallas_src>
import functools

import jax
import jax.numpy as jnp
from jax.experimental import pallas as pl
from jax.experimental.pallas import tpu as pltpu

LANE = 128      # padded hidden width (lane dim)
TB_MIN = 8      # sublane granularity
TB_MAX = 1024   # max batch tile (per-step overhead amortization)
H1, H2 = 40, 20


def _round_up(x, m):
    return ((x + m - 1) // m) * m


def _choose_tb(batch):
    """Pick a batch tile: as large as possible (<=TB_MAX), multiple of 8, and keep
    >= 2 grid steps when the batch allows so both TensorCores get work."""
    tb = min(TB_MAX, _round_up(batch, TB_MIN))
    if _round_up(batch, tb) // tb < 2 and tb > TB_MIN:
        tb = max(TB_MIN, _round_up(batch, 2 * TB_MIN) // 2)
    return tb


def _mlp_kernel(x_ref, w1_ref, b1_ref, w2_ref, b2_ref, w3_ref, b3_ref, o_ref):
    # Layer 1: Linear + ReLU   (TB, n_in) @ (n_in, 128) -> (TB, 128)
    h1 = jnp.dot(x_ref[...], w1_ref[...], preferred_element_type=jnp.float32)
    h1 = jnp.maximum(h1 + b1_ref[...], 0.0)
    # Layer 2: Linear + ReLU   (TB, 128) @ (128, 128) -> (TB, 128)
    h2 = jnp.dot(h1, w2_ref[...], preferred_element_type=jnp.float32)
    h2 = jnp.maximum(h2 + b2_ref[...], 0.0)
    # Layer 3: Linear          (TB, 128) @ (128, n_out) -> (TB, n_out)
    out = jnp.dot(h2, w3_ref[...], preferred_element_type=jnp.float32) + b3_ref[...]
    o_ref[...] = out.astype(o_ref.dtype)


def _pad2d(a, rows, cols):
    r, c = a.shape
    return jnp.pad(a, ((0, rows - r), (0, cols - c)))


def prepare_params(params):
    """Pad weights/biases for the kernel ONCE (hoisted out of the per-call path).

    Padded hidden lanes get zero weights + zero biases, so ReLU keeps them exactly
    zero and they never perturb the real outputs."""
    w1, b1, w2, b2, w3, b3 = params
    n_in = w1.shape[0]
    n_out = w3.shape[1]
    assert max(n_in, w1.shape[1], w3.shape[0], n_out) <= LANE, \
        "feature dims must be <= 128 lanes"
    w1_p = _pad2d(w1.astype(jnp.float32), n_in, LANE)    # (n_in, 128)
    w2_p = _pad2d(w2.astype(jnp.float32), LANE, LANE)    # (128, 128)
    w3_p = _pad2d(w3.astype(jnp.float32), LANE, n_out)   # (128, n_out)
    b1_p = _pad2d(b1.reshape(1, -1).astype(jnp.float32), 1, LANE)
    b2_p = _pad2d(b2.reshape(1, -1).astype(jnp.float32), 1, LANE)
    b3_p = b3.reshape(1, -1).astype(jnp.float32)         # (1, n_out)
    return (w1_p, b1_p, w2_p, b2_p, w3_p, b3_p)


@jax.jit
def nn_dynamics_forward(x, padded_params):
    """Forward pass of NN_Dynamics.  x: (B, n_in) float32 -> (B, n_out) float32.

    `padded_params` must come from prepare_params()."""
    w1_p, b1_p, w2_p, b2_p, w3_p, b3_p = padded_params
    B, n_in = x.shape
    n_out = w3_p.shape[1]

    tb = _choose_tb(B)
    B_pad = _round_up(B, tb)

    x_p = x.astype(jnp.float32)
    if B_pad != B:
        # Padded rows produce bias-only garbage; they are sliced off below.
        x_p = jnp.pad(x_p, ((0, B_pad - B), (0, 0)))

    grid = (B_pad // tb,)
    flops = 2 * B_pad * (n_in * H1 + H1 * H2 + H2 * n_out)
    bytes_accessed = 4 * (
        B_pad * (n_in + n_out)                       # activation traffic
        + n_in * LANE + LANE * LANE + LANE * n_out   # padded weights
        + 2 * LANE + n_out                           # biases
    )

    out_p = pl.pallas_call(
        _mlp_kernel,
        out_shape=jax.ShapeDtypeStruct((B_pad, n_out), jnp.float32),
        grid_spec=pltpu.PrefetchScalarGridSpec(
            num_scalar_prefetch=0,
            grid=grid,
            in_specs=[
                pl.BlockSpec((tb, n_in), lambda i: (i, 0)),      # x tile (natural width)
                pl.BlockSpec((n_in, LANE), lambda i: (0, 0)),    # W1 (resident)
                pl.BlockSpec((1, LANE), lambda i: (0, 0)),       # b1
                pl.BlockSpec((LANE, LANE), lambda i: (0, 0)),    # W2 (resident)
                pl.BlockSpec((1, LANE), lambda i: (0, 0)),       # b2
                pl.BlockSpec((LANE, n_out), lambda i: (0, 0)),   # W3 (resident)
                pl.BlockSpec((1, n_out), lambda i: (0, 0)),      # b3
            ],
            out_specs=pl.BlockSpec((tb, n_out), lambda i: (i, 0)),
        ),
        compiler_params=pltpu.CompilerParams(
            dimension_semantics=("parallel",)),
        cost_estimate=pl.CostEstimate(
            flops=flops, transcendentals=0, bytes_accessed=bytes_accessed),
    )(x_p, w1_p, b1_p, w2_p, b2_p, w3_p, b3_p)

    return out_p[:B]


def init_params(key, n_in, n_out):
    """Deterministic init mimicking torch.nn.Linear defaults (uniform +-1/sqrt(fan_in)).

    Weights stored (in, out)."""
    dims = [(n_in, H1), (H1, H2), (H2, n_out)]
    params = []
    for (fin, fout) in dims:
        key, kw, kb = jax.random.split(key, 3)
        bound = 1.0 / jnp.sqrt(fin)
        w = jax.random.uniform(kw, (fin, fout), jnp.float32, -bound, bound)
        b = jax.random.uniform(kb, (fout,), jnp.float32, -bound, bound)
        params += [w, b]
    return tuple(params)


def _reference_forward(x, params):
    w1, b1, w2, b2, w3, b3 = params
    h1 = jnp.maximum(x @ w1 + b1, 0.0)
    h2 = jnp.maximum(h1 @ w2 + b2, 0.0)
    return h2 @ w3 + b3


if __name__ == "__main__":
    n_in, n_out, batch = 4, 4, 8

    key = jax.random.PRNGKey(0)
    kp, kx = jax.random.split(key)
    params = init_params(kp, n_in, n_out)
    padded_params = prepare_params(params)   # one-time padding (hoisted)
    x = jax.random.normal(kx, (batch, n_in), jnp.float32)

    y = nn_dynamics_forward(x, padded_params)
    y = jax.block_until_ready(y)

    y_ref = _reference_forward(x, params)
    assert y.shape == (batch, n_out)
    assert jnp.allclose(y, y_ref, atol=1e-5, rtol=1e-5), "Pallas output mismatch"

    # Also exercise a non-trivial / non-divisible batch to cover the tiling path.
    x2 = jax.random.normal(jax.random.PRNGKey(1), (100, n_in), jnp.float32)
    y2 = jax.block_until_ready(nn_dynamics_forward(x2, padded_params))
    assert jnp.allclose(y2, _reference_forward(x2, params), atol=1e-5, rtol=1e-5)

    print("KERNEL_OK")
</pallas_src>

<mosaic_0001>
module attributes {stable_mosaic.version = 11 : i64} {
  func.func @_mlp_kernel(%arg0: i32, %arg1: memref<8x4xf32, #tpu.memory_space<vmem>>, %arg2: memref<4x128xf32, #tpu.memory_space<vmem>>, %arg3: memref<1x128xf32, #tpu.memory_space<vmem>>, %arg4: memref<128x128xf32, #tpu.memory_space<vmem>>, %arg5: memref<1x128xf32, #tpu.memory_space<vmem>>, %arg6: memref<128x4xf32, #tpu.memory_space<vmem>>, %arg7: memref<1x4xf32, #tpu.memory_space<vmem>>, %arg8: memref<8x4xf32, #tpu.memory_space<vmem>>) attributes {dimension_semantics = [#tpu.dimension_semantics<parallel>], iteration_bounds = array<i64: 1>, scalar_prefetch = 0 : i64, scratch_operands = 0 : i64, tpu.core_type = #tpu.core_type<tc>, window_params = [{transform_indices = @transform_0, window_bounds = array<i64: 8, 4>}, {pipeline_mode = #tpu.pipeline_mode<synchronous>, transform_indices = @transform_1, window_bounds = array<i64: 4, 128>}, {pipeline_mode = #tpu.pipeline_mode<synchronous>, transform_indices = @transform_2, window_bounds = array<i64: 1, 128>}, {pipeline_mode = #tpu.pipeline_mode<synchronous>, transform_indices = @transform_3, window_bounds = array<i64: 128, 128>}, {pipeline_mode = #tpu.pipeline_mode<synchronous>, transform_indices = @transform_4, window_bounds = array<i64: 1, 128>}, {pipeline_mode = #tpu.pipeline_mode<synchronous>, transform_indices = @transform_5, window_bounds = array<i64: 128, 4>}, {pipeline_mode = #tpu.pipeline_mode<synchronous>, transform_indices = @transform_6, window_bounds = array<i64: 1, 4>}, {transform_indices = @transform_7, window_bounds = array<i64: 8, 4>}]} {
    %c0 = arith.constant 0 : index
    %c0_0 = arith.constant 0 : index
    %0 = vector.load %arg1[%c0, %c0_0] : memref<8x4xf32, #tpu.memory_space<vmem>>, vector<8x4xf32>
    %c0_1 = arith.constant 0 : index
    %c0_2 = arith.constant 0 : index
    %1 = vector.load %arg2[%c0_1, %c0_2] : memref<4x128xf32, #tpu.memory_space<vmem>>, vector<4x128xf32>
    %cst = arith.constant dense<0.000000e+00> : vector<8x128xf32>
    %2 = tpu.matmul %0, %1, %cst {dimension_numbers = #tpu.dot_dimension_numbers<[1], [0], [0], [1], [0, 0, 1, 1], [], []>} : vector<8x4xf32>, vector<4x128xf32>, vector<8x128xf32> -> vector<8x128xf32>
    %c0_3 = arith.constant 0 : index
    %c0_4 = arith.constant 0 : index
    %3 = vector.load %arg3[%c0_3, %c0_4] : memref<1x128xf32, #tpu.memory_space<vmem>>, vector<1x128xf32>
    %4 = vector.broadcast %3 : vector<1x128xf32> to vector<8x128xf32>
    %5 = arith.addf %2, %4 : vector<8x128xf32>
    %cst_5 = arith.constant 0.000000e+00 : f32
    %6 = vector.broadcast %cst_5 : f32 to vector<8x128xf32>
    %7 = arith.maximumf %5, %6 : vector<8x128xf32>
    %c0_6 = arith.constant 0 : index
    %c0_7 = arith.constant 0 : index
    %8 = vector.load %arg4[%c0_6, %c0_7] : memref<128x128xf32, #tpu.memory_space<vmem>>, vector<128x128xf32>
    %cst_8 = arith.constant dense<0.000000e+00> : vector<8x128xf32>
    %9 = tpu.matmul %7, %8, %cst_8 {dimension_numbers = #tpu.dot_dimension_numbers<[1], [0], [0], [1], [0, 0, 1, 1], [], []>} : vector<8x128xf32>, vector<128x128xf32>, vector<8x128xf32> -> vector<8x128xf32>
    %c0_9 = arith.constant 0 : index
    %c0_10 = arith.constant 0 : index
    %10 = vector.load %arg5[%c0_9, %c0_10] : memref<1x128xf32, #tpu.memory_space<vmem>>, vector<1x128xf32>
    %11 = vector.broadcast %10 : vector<1x128xf32> to vector<8x128xf32>
    %12 = arith.addf %9, %11 : vector<8x128xf32>
    %cst_11 = arith.constant 0.000000e+00 : f32
    %13 = vector.broadcast %cst_11 : f32 to vector<8x128xf32>
    %14 = arith.maximumf %12, %13 : vector<8x128xf32>
    %c0_12 = arith.constant 0 : index
    %c0_13 = arith.constant 0 : index
    %15 = vector.load %arg6[%c0_12, %c0_13] : memref<128x4xf32, #tpu.memory_space<vmem>>, vector<128x4xf32>
    %cst_14 = arith.constant dense<0.000000e+00> : vector<8x4xf32>
    %16 = tpu.matmul %14, %15, %cst_14 {dimension_numbers = #tpu.dot_dimension_numbers<[1], [0], [0], [1], [0, 0, 1, 1], [], []>} : vector<8x128xf32>, vector<128x4xf32>, vector<8x4xf32> -> vector<8x4xf32>
    %c0_15 = arith.constant 0 : index
    %c0_16 = arith.constant 0 : index
    %17 = vector.load %arg7[%c0_15, %c0_16] : memref<1x4xf32, #tpu.memory_space<vmem>>, vector<1x4xf32>
    %18 = vector.broadcast %17 : vector<1x4xf32> to vector<8x4xf32>
    %19 = arith.addf %16, %18 : vector<8x4xf32>
    %c0_17 = arith.constant 0 : index
    %c0_18 = arith.constant 0 : index
    %20 = vector.load %arg8[%c0_17, %c0_18] : memref<8x4xf32, #tpu.memory_space<vmem>>, vector<8x4xf32>
    tpu.vector_store %arg8[%c0_17, %c0_18], %19 {strides = array<i32>} : memref<8x4xf32, #tpu.memory_space<vmem>>, vector<8x4xf32>,
    return
  }
  func.func @transform_0(%arg0: i32) -> (i32, i32) {
    %c0_i32 = arith.constant 0 : i32
    %c0_i32_0 = arith.constant 0 : i32
    return %arg0, %c0_i32 : i32, i32
  }
  func.func @transform_1(%arg0: i32) -> (i32, i32) {
    %c0_i32 = arith.constant 0 : i32
    %c0_i32_0 = arith.constant 0 : i32
    %c0_i32_1 = arith.constant 0 : i32
    return %c0_i32, %c0_i32_0 : i32, i32
  }
  func.func @transform_2(%arg0: i32) -> (i32, i32) {
    %c0_i32 = arith.constant 0 : i32
    %c0_i32_0 = arith.constant 0 : i32
    %c0_i32_1 = arith.constant 0 : i32
    return %c0_i32, %c0_i32_0 : i32, i32
  }
  func.func @transform_3(%arg0: i32) -> (i32, i32) {
    %c0_i32 = arith.constant 0 : i32
    %c0_i32_0 = arith.constant 0 : i32
    %c0_i32_1 = arith.constant 0 : i32
    return %c0_i32, %c0_i32_0 : i32, i32
  }
  func.func @transform_4(%arg0: i32) -> (i32, i32) {
    %c0_i32 = arith.constant 0 : i32
    %c0_i32_0 = arith.constant 0 : i32
    %c0_i32_1 = arith.constant 0 : i32
    return %c0_i32, %c0_i32_0 : i32, i32
  }
  func.func @transform_5(%arg0: i32) -> (i32, i32) {
    %c0_i32 = arith.constant 0 : i32
    %c0_i32_0 = arith.constant 0 : i32
    %c0_i32_1 = arith.constant 0 : i32
    return %c0_i32, %c0_i32_0 : i32, i32
  }
  func.func @transform_6(%arg0: i32) -> (i32, i32) {
    %c0_i32 = arith.constant 0 : i32
    %c0_i32_0 = arith.constant 0 : i32
    %c0_i32_1 = arith.constant 0 : i32
    return %c0_i32, %c0_i32_0 : i32, i32
  }
  func.func @transform_7(%arg0: i32) -> (i32, i32) {
    %c0_i32 = arith.constant 0 : i32
    %c0_i32_0 = arith.constant 0 : i32
    return %arg0, %c0_i32 : i32, i32
  }
}

</mosaic_0001>

<bundles_post_ra>
// kernel: nn_dynamics_forward.1
= control target key start
LH: loop header
LB: loop body
LE: loop exit
PB: predicated region body
PF: predicated region fallthrough
CT: control target
= control target key end

     0   :  { %vm39_vm0 = vcmask 1043456   ;;  %vm35_vm1 = vcmask 31744   ;;  %v473_v0 = vmov 0.0   ;;  %vm474_vm2 = vmmov 0   ;;  %s648_s1 = inlined_call_operand.vmem [shape: f32[4,128], index: 1, kind: input, shape index: {}]   ;;  %s649_s0 = inlined_call_operand.vmem [shape: f32[8,4], index: 0, kind: input, shape index: {}]   ;;  %s650_s3 = inlined_call_operand.vmem [shape: f32[128,128], index: 3, kind: input, shape index: {}]   ;;  %s651_s5 = inlined_call_operand.vmem [shape: f32[128,4], index: 5, kind: input, shape index: {}]   ;;  %s652_s2 = inlined_call_operand.vmem [shape: f32[1,128], index: 2, kind: input, shape index: {}]   ;;  %s653_s4 = inlined_call_operand.vmem [shape: f32[1,128], index: 4, kind: input, shape index: {}]   ;;  %s654_s6 = inlined_call_operand.vmem [shape: f32[1,4], index: 6, kind: input, shape index: {}]   ;;  %s655_s7 = inlined_call_operand.vmem [shape: f32[8,4], index: 7, kind: output, shape index: {}]  }
   0x1   :  { %347 = vmatprep.subr.mxu0 %v473_v0  ;;  %v27_v1 = vld [vmem:[%s648_s1] sm:$0xf]  ;;  %349 = vmatprep.mubr.msk.f32.mxu0 %vm474_vm2, %v473_v0  ;;  %v475_v4 = vmov 0.0|0.0   ;;  %v115_v5 = vld [vmem:[%s650_s3 + $0x8] sm:$0xff]  ;;  %v116_v6 = vld [vmem:[%s650_s3 + $0x10] sm:$0xff] }
   0x2   :  { %v26_v2 = vld [vmem:[%s649_s0] sm:$0xff]  ;;  %348 = vmatpush3.msk.msra.mxu0 %vm39_vm0, %v27_v1  ;;  %422 = vmatprep.subr.bf16.mxu1 %v475_v4  ;;  %v117_v7 = vld [vmem:[%s650_s3 + $0x18] sm:$0xff]  ;;  %v119_v11 = vld [vmem:[%s650_s3 + $0x28] sm:$0xff] }
   0x3   :  { %v114_v3 = vld [vmem:[%s650_s3] sm:$0xff]  ;;  %350 = vmatmul.mubr.msk.f32.vlgmr.msra.gmra.mrb[0].mxu0 %vm35_vm1, %v26_v2  ;;  %384 = vmatprep.mubr.msk.f32.mxu1 %vm474_vm2, %v473_v0  ;;  %v426_v9 = vpack.c.bf16 %v117_v7, %v116_v6  ;;  %v120_v13 = vld [vmem:[%s650_s3 + $0x30] sm:$0xff]  ;;  %v121_v14 = vld [vmem:[%s650_s3 + $0x38] sm:$0xff] }
   0x4   :  { %v423_v8 = vpack.c.bf16 %v115_v5, %v114_v3  ;;  %446 = vmatprep.subr.bf16.mxu0 %v475_v4  ;;  %419 = vmatprep.mubr.msk.f32.mxu0 %vm474_vm2, %v473_v0  ;;  %v118_v10 = vld [vmem:[%s650_s3 + $0x20] sm:$0xff]  ;;  %v432_v15 = vpack.c.bf16 %v121_v14, %v120_v13  ;;  %v123_v17 = vld [vmem:[%s650_s3 + $0x48] sm:$0xff]  ;;  %v124_v19 = vld [vmem:[%s650_s3 + $0x50] sm:$0xff] }
   0x5   :  { %v429_v12 = vpack.c.bf16 %v119_v11, %v118_v10  ;;  %v122_v16 = vld [vmem:[%s650_s3 + $0x40] sm:$0xff]  ;;  %v125_v20 = vld [vmem:[%s650_s3 + $0x58] sm:$0xff]  ;;  %v127_v23 = vld [vmem:[%s650_s3 + $0x68] sm:$0xff] }
   0x6   :  { %424 = vmatpush3.bf16.msra.mxu1 %v423_v8  ;;  %v435_v18 = vpack.c.bf16 %v123_v17, %v122_v16  ;;  %v438_v21 = vpack.c.bf16 %v125_v20, %v124_v19  ;;  %v126_v22 = vld [vmem:[%s650_s3 + $0x60] sm:$0xff]  ;;  %v128_v25 = vld [vmem:[%s650_s3 + $0x70] sm:$0xff]  ;;  %v129_v26 = vld [vmem:[%s650_s3 + $0x78] sm:$0xff] }
   0x7   :  { %425 = vmatprep.subr.bf16.mxu1 %v475_v4  ;;  %v441_v24 = vpack.c.bf16 %v127_v23, %v126_v22  ;;  %v444_v27 = vpack.c.bf16 %v129_v26, %v128_v25  ;;  %v208_v28 = vld [vmem:[%s651_s5] sm:$0xff]  ;;  %v209_v29 = vld [vmem:[%s651_s5 + $0x8] sm:$0xff]  ;;  %v210_v30 = vld [vmem:[%s651_s5 + $0x10] sm:$0xff] }
   0x8   :  { %v447_v31 = vpack.c.bf16 %v209_v29, %v208_v28  ;;  %v211_v32 = vld [vmem:[%s651_s5 + $0x18] sm:$0xff]  ;;  %v212_v34 = vld [vmem:[%s651_s5 + $0x20] sm:$0xff]  ;;  %v213_v35 = vld [vmem:[%s651_s5 + $0x28] sm:$0xff] }
   0x9   :  { %v450_v33 = vpack.c.bf16 %v211_v32, %v210_v30  ;;  %v453_v36 = vpack.c.bf16 %v213_v35, %v212_v34  ;;  %v214_v37 = vld [vmem:[%s651_s5 + $0x30] sm:$0xff]  ;;  %v215_v38 = vld [vmem:[%s651_s5 + $0x38] sm:$0xff]  ;;  %v216_v40 = vld [vmem:[%s651_s5 + $0x40] sm:$0xff] }
   0xa   :  { %427 = vmatpush3.bf16.msra.mxu1 %v426_v9  ;;  %448 = vmatpush3.bf16.msra.mxu0 %v447_v31  ;;  %v456_v39 = vpack.c.bf16 %v215_v38, %v214_v37  ;;  %v217_v41 = vld [vmem:[%s651_s5 + $0x48] sm:$0xff]  ;;  %v218_v43 = vld [vmem:[%s651_s5 + $0x50] sm:$0xff]  ;;  %v219_v44 = vld [vmem:[%s651_s5 + $0x58] sm:$0xff] }
   0xb   :  { %428 = vmatprep.subr.bf16.mxu1 %v475_v4  ;;  %449 = vmatprep.subr.bf16.mxu0 %v475_v4  ;;  %v459_v42 = vpack.c.bf16 %v217_v41, %v216_v40  ;;  %v462_v45 = vpack.c.bf16 %v219_v44, %v218_v43  ;;  %v220_v46 = vld [vmem:[%s651_s5 + $0x60] sm:$0xff]  ;;  %v221_v47 = vld [vmem:[%s651_s5 + $0x68] sm:$0xff]  ;;  %v222_v54 = vld [vmem:[%s651_s5 + $0x70] sm:$0xff] }
   0xc   :  { %v465_v48 = vpack.c.bf16 %v221_v47, %v220_v46  ;;  %v306_v49 = vld [vmem:[%s652_s2] ss:$0 sm:$0xff]  ;;  %v223_v55 = vld [vmem:[%s651_s5 + $0x78] sm:$0xff] }
   0xd   :  { %v468_v56 = vpack.c.bf16 %v223_v55, %v222_v54  ;;  %v309_v57 = vld [vmem:[%s653_s4] ss:$0 sm:$0xff] }
   0xe   :  { %430 = vmatpush3.bf16.msra.mxu1 %v429_v12  ;;  %451 = vmatpush3.bf16.msra.mxu0 %v450_v33  ;;  %v310_v62 = vld [vmem:[%s654_s6] ss:$0 sm:$0xff] }
   0xf   :  { %431 = vmatprep.subr.bf16.mxu1 %v475_v4  ;;  %452 = vmatprep.subr.bf16.mxu0 %v475_v4 }
  0x12   :  { %433 = vmatpush3.bf16.msra.mxu1 %v432_v15  ;;  %454 = vmatpush3.bf16.msra.mxu0 %v453_v36 }
  0x13   :  { %434 = vmatprep.subr.bf16.mxu1 %v475_v4  ;;  %455 = vmatprep.subr.bf16.mxu0 %v475_v4 }
  0x16   :  { %436 = vmatpush3.bf16.msra.mxu1 %v435_v18  ;;  %457 = vmatpush3.bf16.msra.mxu0 %v456_v39 }
  0x17   :  { %437 = vmatprep.subr.bf16.mxu1 %v475_v4  ;;  %458 = vmatprep.subr.bf16.mxu0 %v475_v4 }
  0x1a   :  { %439 = vmatpush3.bf16.msra.mxu1 %v438_v21  ;;  %460 = vmatpush3.bf16.msra.mxu0 %v459_v42 }
  0x1b   :  { %440 = vmatprep.subr.bf16.mxu1 %v475_v4  ;;  %461 = vmatprep.subr.bf16.mxu0 %v475_v4 }
  0x1e   :  { %442 = vmatpush3.bf16.msra.mxu1 %v441_v24  ;;  %463 = vmatpush3.bf16.msra.mxu0 %v462_v45 }
  0x1f   :  { %443 = vmatprep.subr.bf16.mxu1 %v475_v4  ;;  %464 = vmatprep.subr.bf16.mxu0 %v475_v4 }
  0x22   :  { %445 = vmatpush3.bf16.msra.mxu1 %v444_v27  ;;  %466 = vmatpush3.bf16.msra.mxu0 %v465_v48 }
  0x23   :  { %467 = vmatprep.subr.bf16.mxu0 %v475_v4 }
  0x26   :  { %469 = vmatpush3.bf16.msra.mxu0 %v468_v56 }
  0xd6   :  { %v109_v50 = vpop.f32.mrb[0].mxu0 }
  0xd7   :  { %v110_v51 = vadd.f32 %v306_v49, %v109_v50  ;;  %v351_v52 = vpop.f32.mrb[1].mxu0 }
  0xd9   :  { %v113_v53 = vmax.f32 %v110_v51, 0.0 }
  0xdb   :  { %385 = vmatmul.mubr.f32.vlgmr.msra.gmra.mrb[0].mxu1 %v113_v53 }
 0x1ae   :  { %v203_v58 = vpop.f32.mrb[0].mxu1 }
 0x1af   :  { %v204_v59 = vadd.f32 %v309_v57, %v203_v58  ;;  %v386_v60 = vpop.f32.mrb[1].mxu1 }
 0x1b1   :  { %v207_v61 = vmax.f32 %v204_v59, 0.0 }
 0x1b3   :  { %420 = vmatmul.mubr.f32.vlgmr.msra.gmra.mrb[2].mxu0 %v207_v61 }
 0x286   :  { %v297_v63 = vpop.f32.mrb[2].mxu0 }
 0x287   :  { %v298_v0 = vadd.f32 %v310_v62, %v297_v63  ;;  %v421_v1 = vpop.f32.mrb[3].mxu0 }
 0x289   :  { %301 = vst.msk [vmem:[%s655_s7] sm:$0xff] %vm35_vm1, %v298_v0 }

</bundles_post_ra>
